<compile_context>
chip_gen: v7x
topology: tpu7x:2x2x1
jax: 0.10.0
libtpu: 0.0.40
codegen_flags: <defaults>
</compile_context>

<pallas_src>
import functools

import numpy as np
import jax
import jax.numpy as jnp
from jax import lax
from jax.experimental import pallas as pl
from jax.experimental.pallas import tpu as pltpu

POOL_K = 6  # AvgPool2d kernel_size (fixed in the module)


def _round_up(x, m):
    return ((x + m - 1) // m) * m


def _aux_classifier_kernel(x_ref, c_ref, o_ref, *, NB, HW, CIN_A, CMID_A, NC, HOWO,
                           OFF2, OFF3):
    # x_ref: (CIN_A, NB*HW)   lane-dense batch-folded input, last row == 1.0
    # c_ref: (ROWS, HW)       packed constants:
    #            rows [0, CMID_A)        cols [0, CIN_A)  : W1_aug ([W1|b1] + ones-propagator row)
    #            rows [OFF2, OFF2+NC)    cols [0, CMID_A) : W2_aug ([W2|b2])
    #            rows [OFF3, OFF3+HOWO)  cols [0, HW)     : pooling matrix (Ho*Wo, HW)
    # o_ref: (NB, NC, HOWO)
    w1a = c_ref[0:CMID_A, 0:CIN_A]              # (Cmid+1, Cin+1)
    w2a = c_ref[OFF2:OFF2 + NC, 0:CMID_A]       # (NC, Cmid+1)
    ptt = c_ref[OFF3:OFF3 + HOWO, 0:HW]         # (HoWo, HW), lane-dense

    x = x_ref[...]                                                    # (Cin+1, NB*HW)
    # Conv2d(inplanes, 96, k=1) + bias + ReLU  (bias folded; last row of h stays 1.0)
    h = jnp.maximum(jnp.dot(w1a, x, preferred_element_type=jnp.float32), 0.0)   # (Cmid+1, L)
    # Conv2d(96, num_classes, k=1) + bias + ReLU  (bias via the carried ones row)
    y = jnp.maximum(jnp.dot(w2a, h, preferred_element_type=jnp.float32), 0.0)   # (NC, L)

    # AvgPool2d(6, stride=num_classes) as a 256-deep MXU contraction per image.
    for n in range(NB):  # NB is a small static int
        yn = y[:, n * HW:(n + 1) * HW]                                # (NC, HW), lane-aligned slice
        o_ref[n] = lax.dot_general(
            yn, ptt, dimension_numbers=(((1,), (1,)), ((), ())),
            preferred_element_type=jnp.float32).astype(o_ref.dtype)   # (NC, HoWo)


def _make_pool_matrix(H, W, Ho, Wo, stride):
    """Constant (Ho*Wo, H*W) matrix: 1/(K*K) over each 6x6 window, stride=num_classes."""
    P = np.zeros((Ho * Wo, H * W), dtype=np.float32)
    for ho in range(Ho):
        for wo in range(Wo):
            r = ho * Wo + wo
            for dh in range(POOL_K):
                for dw in range(POOL_K):
                    P[r, (ho * stride + dh) * W + (wo * stride + dw)] = 1.0 / (POOL_K * POOL_K)
    return jnp.asarray(P)


def _num_grid_steps(N):
    """1 step on single-TC chips (v5e/v6e); 2 'parallel' steps on v7x megacore;
    modest fixed block for large N so the x DMA pipelines and VMEM stays bounded."""
    try:
        kind = jax.devices()[0].device_kind.lower()
    except Exception:
        kind = ""
    two_cores = "v7" in kind
    if N > 16:
        for nb in (16, 8, 4, 2):
            if N % nb == 0:
                return N // nb
        return N
    if two_cores and N >= 2 and N % 2 == 0:
        return 2
    return 1


def auxiliary_classifier(x_nchw, w1, b1, w2, b2, num_classes):
    """x_nchw: (N, inplanes, H, W); w1: (96, inplanes, 1, 1); w2: (NC, 96, 1, 1)."""
    N, Cin, H, W = x_nchw.shape
    Cmid = w1.shape[0]            # 96
    NC = num_classes
    stride = num_classes          # AvgPool2d(6, num_classes) -> stride = num_classes
    Ho = (H - POOL_K) // stride + 1
    Wo = (W - POOL_K) // stride + 1
    HW = H * W
    HOWO = Ho * Wo
    CIN_A, CMID_A = Cin + 1, Cmid + 1
    assert HW >= CMID_A and HW % 128 == 0, "H*W must be lane-dense and hold W2_aug"

    # ---- Input: append ones row (bias fold) and lay out lane-dense (Cin+1, N*HW).
    # All wrapper ops are tiny XLA ops (concat / transpose / reshape of ~KiB data).
    x_flat = x_nchw.reshape(N, Cin, HW).astype(jnp.float32)
    x_aug = jnp.concatenate([x_flat, jnp.ones((N, 1, HW), jnp.float32)], axis=1)  # (N, Cin+1, HW)
    x_wide = jnp.transpose(x_aug, (1, 0, 2)).reshape(CIN_A, N * HW)               # (Cin+1, N*HW)

    # ---- Constants: fold biases into weights and pack everything into one slab.
    w1m = w1.reshape(Cmid, Cin).astype(jnp.float32)
    b1v = b1.reshape(Cmid, 1).astype(jnp.float32)
    w2m = w2.reshape(NC, Cmid).astype(jnp.float32)
    b2v = b2.reshape(NC, 1).astype(jnp.float32)

    prop_row = jnp.zeros((1, CIN_A), jnp.float32).at[0, Cin].set(1.0)   # [0..0, 1]
    w1a = jnp.concatenate([jnp.concatenate([w1m, b1v], axis=1), prop_row], axis=0)  # (Cmid+1, Cin+1)
    w2a = jnp.concatenate([w2m, b2v], axis=1)                                        # (NC, Cmid+1)
    ptt = _make_pool_matrix(H, W, Ho, Wo, stride)                                    # (HoWo, HW)

    def _pad(a, rows, cols):
        return jnp.pad(a, ((0, rows - a.shape[0]), (0, cols - a.shape[1])))

    R1 = _round_up(CMID_A, 8)
    R2 = _round_up(NC, 8)
    R3 = _round_up(HOWO, 8)
    OFF2, OFF3 = R1, R1 + R2
    const_slab = jnp.concatenate(
        [_pad(w1a, R1, HW), _pad(w2a, R2, HW), _pad(ptt, R3, HW)], axis=0)           # (ROWS, HW)
    ROWS = R1 + R2 + R3

    num_steps = _num_grid_steps(N)
    NB = N // num_steps

    kernel = functools.partial(
        _aux_classifier_kernel, NB=NB, HW=HW, CIN_A=CIN_A, CMID_A=CMID_A,
        NC=NC, HOWO=HOWO, OFF2=OFF2, OFF3=OFF3)

    out_flat = pl.pallas_call(
        kernel,
        out_shape=jax.ShapeDtypeStruct((N, NC, HOWO), jnp.float32),
        grid_spec=pltpu.PrefetchScalarGridSpec(
            num_scalar_prefetch=0,
            grid=(num_steps,),
            in_specs=[
                pl.BlockSpec((CIN_A, NB * HW), lambda g: (0, g)),   # batch slab along lanes
                pl.BlockSpec((ROWS, HW), lambda g: (0, 0)),         # packed constants (one DMA)
            ],
            out_specs=pl.BlockSpec((NB, NC, HOWO), lambda g: (g, 0, 0)),
        ),
        compiler_params=pltpu.CompilerParams(dimension_semantics=("parallel",)),
    )(x_wide, const_slab)

    # Free HBM reshape to the PyTorch output layout.
    return out_flat.reshape(N, NC, Ho, Wo)


def _reference(x_nchw, w1, b1, w2, b2, num_classes):
    """Pure-JAX reference mirroring the PyTorch forward pass."""
    N, Cin, H, W = x_nchw.shape
    Cmid = w1.shape[0]
    NC = num_classes
    stride = num_classes
    Ho = (H - POOL_K) // stride + 1
    Wo = (W - POOL_K) // stride + 1

    x = jnp.transpose(x_nchw, (0, 2, 3, 1)).astype(jnp.float32)
    h = jnp.maximum(jnp.einsum('nhwc,oc->nhwo', x, w1.reshape(Cmid, Cin)) + b1, 0.0)
    y = jnp.maximum(jnp.einsum('nhwc,oc->nhwo', h, w2.reshape(NC, Cmid)) + b2, 0.0)

    rows = []
    for ho in range(Ho):
        cols = []
        for wo in range(Wo):
            win = y[:, ho * stride:ho * stride + POOL_K,
                       wo * stride:wo * stride + POOL_K, :]
            cols.append(jnp.mean(win, axis=(1, 2)))
        rows.append(jnp.stack(cols, axis=1))
    pooled = jnp.stack(rows, axis=1)                                      # (N, Ho, Wo, NC)
    return jnp.transpose(pooled, (0, 3, 1, 2))


if __name__ == "__main__":
    # Small shapes consistent with the module: inplanes=8, num_classes=10,
    # 16x16 spatial (pool output = 2x2), batch=2.
    N, INPLANES, H, W = 2, 8, 16, 16
    NUM_CLASSES = 10
    CMID = 96

    key = jax.random.PRNGKey(0)
    kx, kw1, kb1, kw2, kb2 = jax.random.split(key, 5)

    x = jax.random.normal(kx, (N, INPLANES, H, W), dtype=jnp.float32)
    w1 = jax.random.normal(kw1, (CMID, INPLANES, 1, 1), dtype=jnp.float32) * 0.1
    b1 = jax.random.normal(kb1, (CMID,), dtype=jnp.float32) * 0.1
    w2 = jax.random.normal(kw2, (NUM_CLASSES, CMID, 1, 1), dtype=jnp.float32) * 0.1
    b2 = jax.random.normal(kb2, (NUM_CLASSES,), dtype=jnp.float32) * 0.1

    out = auxiliary_classifier(x, w1, b1, w2, b2, NUM_CLASSES)
    out = jax.block_until_ready(out)

    ref = _reference(x, w1, b1, w2, b2, NUM_CLASSES)
    assert out.shape == (N, NUM_CLASSES, 2, 2), out.shape
    assert jnp.allclose(out, ref, atol=1e-4, rtol=1e-4), "mismatch vs reference"

    print("KERNEL_OK")
</pallas_src>

<mosaic_0001>
module attributes {stable_mosaic.version = 11 : i64} {
  func.func @_aux_classifier_kernel(%arg0: i32, %arg1: memref<9x512xf32, #tpu.memory_space<vmem>>, %arg2: memref<128x256xf32, #tpu.memory_space<vmem>>, %arg3: memref<2x10x4xf32, #tpu.memory_space<vmem>>) attributes {dimension_semantics = [#tpu.dimension_semantics<parallel>], iteration_bounds = array<i64: 1>, scalar_prefetch = 0 : i64, scratch_operands = 0 : i64, tpu.core_type = #tpu.core_type<tc>, window_params = [{transform_indices = @transform_0, window_bounds = array<i64: 9, 512>}, {pipeline_mode = #tpu.pipeline_mode<synchronous>, transform_indices = @transform_1, window_bounds = array<i64: 128, 256>}, {transform_indices = @transform_2, window_bounds = array<i64: 2, 10, 4>}]} {
    %c0 = arith.constant 0 : index
    %c0_0 = arith.constant 0 : index
    %0 = vector.load %arg2[%c0, %c0_0] : memref<128x256xf32, #tpu.memory_space<vmem>>, vector<97x9xf32>
    %c104 = arith.constant 104 : index
    %c0_1 = arith.constant 0 : index
    %1 = vector.load %arg2[%c104, %c0_1] : memref<128x256xf32, #tpu.memory_space<vmem>>, vector<10x97xf32>
    %c120 = arith.constant 120 : index
    %c0_2 = arith.constant 0 : index
    %2 = vector.load %arg2[%c120, %c0_2] : memref<128x256xf32, #tpu.memory_space<vmem>>, vector<4x256xf32>
    %c0_3 = arith.constant 0 : index
    %c0_4 = arith.constant 0 : index
    %3 = vector.load %arg1[%c0_3, %c0_4] : memref<9x512xf32, #tpu.memory_space<vmem>>, vector<9x512xf32>
    %cst = arith.constant dense<0.000000e+00> : vector<97x512xf32>
    %4 = tpu.matmul %0, %3, %cst {dimension_numbers = #tpu.dot_dimension_numbers<[1], [0], [0], [1], [0, 0, 1, 1], [], []>} : vector<97x9xf32>, vector<9x512xf32>, vector<97x512xf32> -> vector<97x512xf32>
    %cst_5 = arith.constant 0.000000e+00 : f32
    %5 = vector.broadcast %cst_5 : f32 to vector<97x512xf32>
    %6 = arith.maximumf %4, %5 : vector<97x512xf32>
    %cst_6 = arith.constant dense<0.000000e+00> : vector<10x512xf32>
    %7 = tpu.matmul %1, %6, %cst_6 {dimension_numbers = #tpu.dot_dimension_numbers<[1], [0], [0], [1], [0, 0, 1, 1], [], []>} : vector<10x97xf32>, vector<97x512xf32>, vector<10x512xf32> -> vector<10x512xf32>
    %cst_7 = arith.constant 0.000000e+00 : f32
    %8 = vector.broadcast %cst_7 : f32 to vector<10x512xf32>
    %9 = arith.maximumf %7, %8 : vector<10x512xf32>
    %10 = vector.extract_strided_slice %9 {offsets = [0, 0], sizes = [10, 256], strides = [1, 1]} : vector<10x512xf32> to vector<10x256xf32>
    %cst_8 = arith.constant dense<0.000000e+00> : vector<10x4xf32>
    %11 = tpu.matmul %10, %2, %cst_8 {dimension_numbers = #tpu.dot_dimension_numbers<[1], [1], [0], [0], [0, 0, 1, 0], [], []>} : vector<10x256xf32>, vector<4x256xf32>, vector<10x4xf32> -> vector<10x4xf32>
    %c0_9 = arith.constant 0 : index
    %c0_10 = arith.constant 0 : index
    %c0_11 = arith.constant 0 : index
    %12 = vector.load %arg3[%c0_9, %c0_10, %c0_11] : memref<2x10x4xf32, #tpu.memory_space<vmem>>, vector<1x10x4xf32>
    %13 = vector.shape_cast %12 : vector<1x10x4xf32> to vector<10x4xf32>
    %14 = vector.shape_cast %11 : vector<10x4xf32> to vector<1x10x4xf32>
    tpu.vector_store %arg3[%c0_9, %c0_10, %c0_11], %14 {strides = array<i32>} : memref<2x10x4xf32, #tpu.memory_space<vmem>>, vector<1x10x4xf32>,
    %15 = vector.extract_strided_slice %9 {offsets = [0, 256], sizes = [10, 256], strides = [1, 1]} : vector<10x512xf32> to vector<10x256xf32>
    %cst_12 = arith.constant dense<0.000000e+00> : vector<10x4xf32>
    %16 = tpu.matmul %15, %2, %cst_12 {dimension_numbers = #tpu.dot_dimension_numbers<[1], [1], [0], [0], [0, 0, 1, 0], [], []>} : vector<10x256xf32>, vector<4x256xf32>, vector<10x4xf32> -> vector<10x4xf32>
    %c1 = arith.constant 1 : index
    %c0_13 = arith.constant 0 : index
    %c0_14 = arith.constant 0 : index
    %17 = vector.load %arg3[%c1, %c0_13, %c0_14] : memref<2x10x4xf32, #tpu.memory_space<vmem>>, vector<1x10x4xf32>
    %18 = vector.shape_cast %17 : vector<1x10x4xf32> to vector<10x4xf32>
    %19 = vector.shape_cast %16 : vector<10x4xf32> to vector<1x10x4xf32>
    tpu.vector_store %arg3[%c1, %c0_13, %c0_14], %19 {strides = array<i32>} : memref<2x10x4xf32, #tpu.memory_space<vmem>>, vector<1x10x4xf32>,
    return
  }
  func.func @transform_0(%arg0: i32) -> (i32, i32) {
    %c0_i32 = arith.constant 0 : i32
    %c0_i32_0 = arith.constant 0 : i32
    return %c0_i32, %arg0 : i32, i32
  }
  func.func @transform_1(%arg0: i32) -> (i32, i32) {
    %c0_i32 = arith.constant 0 : i32
    %c0_i32_0 = arith.constant 0 : i32
    %c0_i32_1 = arith.constant 0 : i32
    return %c0_i32, %c0_i32_0 : i32, i32
  }
  func.func @transform_2(%arg0: i32) -> (i32, i32, i32) {
    %c0_i32 = arith.constant 0 : i32
    %c0_i32_0 = arith.constant 0 : i32
    %c0_i32_1 = arith.constant 0 : i32
    return %arg0, %c0_i32, %c0_i32_0 : i32, i32, i32
  }
}

</mosaic_0001>

<bundles_post_ra>
// kernel: tpu_custom_call.1
= control target key start
LH: loop header
LB: loop body
LE: loop exit
PB: predicated region body
PF: predicated region fallthrough
CT: control target
= control target key end

     0   :  { %7 = vsyncpa [#allocation3], 0  ;;  %s1087_s0 = inlined_call_operand.hbm [shape: f32[9,512], index: 0, kind: input, shape index: {}]   ;;  %s1088_s1 = inlined_call_operand.hbm [shape: f32[128,256], index: 1, kind: input, shape index: {}]   ;;  %s1089_s2 = inlined_call_operand.vmem [shape: f32[2,10,4], index: 2, kind: output, shape index: {}]  }
   0x1   :  { %8 = vsyncpa [#allocation5], 0  ;;  %s955_s9 = smov [#allocation2]   ;;  %s907_s13 = scalar_lea.hbm %s1087_s0, 1024 }
   0x2   :  { %s14_s10 = sshll.u32 %s955_s9, 4  ;;  %p908_p0 = scmp.ne.s32.totalorder %s1087_s0, %s907_s13  ;;  %s15_s10 = int_to_ptr.vmem [resolvable:$true] %s14_s10 }
   0x3   :  { %p911_p1 = scmp.lt.u32.totalorder %s907_s13, %s1087_s0 }
   0x5   :  { %p913_p2 = pnand %p911_p1, %p908_p0 }
   0x7   :  { %916 = shalt.err (!%p913_p2)
}
   0x8   :  { %s917_s18 = scalar_lea.vmem %s15_s10, 1024  ;;  %p922_p4 = scmp.lt.s32.totalorder %s15_s10, %s15_s10 }
   0x9   :  { %p918_p3 = scmp.ne.s32.totalorder %s15_s10, %s917_s18  ;;  %p923_p5 = scmp.lt.s32.totalorder %s917_s18, %s917_s18 }
   0xb   :  { %p924_p6 = por %p923_p5, %p922_p4 }
   0xd   :  { %p925_p7 = pnand %p924_p6, %p918_p3 }
   0xf   :  { %928 = shalt.err (!%p925_p7)
}
  0x10   :  { %s956_s19 = smov 512   ;;  %s957_s20 = smov 32  }
  0x11   :  { %20 = dma.hbm_to_vmem [thread:$0]  %s1087_s0, 1024, %s15_s10, [#allocation3], %s956_s19, %s956_s19, %s957_s20  }
  0x12   :  { %s958_s23 = smov [#allocation4]   ;;  %s929_s27 = scalar_lea.hbm %s1088_s1, 4096 }
  0x13   :  { %s26_s24 = sshll.u32 %s958_s23, 4  ;;  %p930_p8 = scmp.ne.s32.totalorder %s1088_s1, %s929_s27  ;;  %s27_s24 = int_to_ptr.vmem [resolvable:$true] %s26_s24 }
  0x14   :  { %p933_p9 = scmp.lt.u32.totalorder %s929_s27, %s1088_s1 }
  0x16   :  { %p935_p10 = pnand %p933_p9, %p930_p8 }
  0x18   :  { %938 = shalt.err (!%p935_p10)
}
  0x19   :  { %s939_s4 = scalar_lea.vmem %s27_s24, 4096  ;;  %p944_p12 = scmp.lt.s32.totalorder %s27_s24, %s27_s24 }
  0x1a   :  { %p940_p11 = scmp.ne.s32.totalorder %s27_s24, %s939_s4  ;;  %p945_p13 = scmp.lt.s32.totalorder %s939_s4, %s939_s4 }
  0x1c   :  { %p946_p0 = por %p945_p13, %p944_p12 }
  0x1e   :  { %p947_p1 = pnand %p946_p0, %p940_p11 }
  0x20   :  { %950 = shalt.err (!%p947_p1)
}
  0x21   :  { %s959_s0 = smov 256   ;;  %s960_s5 = smov 16  }
  0x22   :  { %32 = dma.hbm_to_vmem [thread:$0]  %s1088_s1, 4096, %s27_s24, [#allocation5], %s959_s0, %s959_s0, %s960_s5  }
  0x23   :  { %951 = dma.done.wait [#allocation3], 1024  }
  0x24   :  { %952 = vsyncadd [#allocation3], 4294966272 }
  0x25   :  { %953 = dma.done.wait [#allocation5], 4096  }
  0x26   :  { %954 = vsyncadd [#allocation5], 4294963200  ;;  %v961_v0 = vmov 0.0   ;;  %vm104_vm0 = vcmask 1040384   ;;  %vm962_vm1 = vmmov 1   ;;  %v57_v2 = vld [vmem:[#allocation2 + $0x8] sm:$0xff] }
  0x27   :  { %181 = vmatprep.mubr.f32.mxu0 %v961_v0  ;;  %324 = vmatprep.mubr.f32.mxu1 %v961_v0  ;;  %vm1005_vm2 = vmpackc.low %vm104_vm0, %vm962_vm1  ;;  %v61_v3 = vld [vmem:[#allocation2 + $0x28] sm:$0x1]  ;;  %v59_v4 = vld [vmem:[#allocation2 + $0x18] sm:$0xff]  ;;  %vm64_vm3 = vcmask 72704   ;;  %vm455_vm4 = vcmask 793600   ;;  %vm711_vm5 = vcmask 31744  }
  0x28   :  { %v839_v5 = vpack.c.bf16 %v61_v3, %v57_v2  ;;  %v63_v6 = vld [vmem:[#allocation2 + $0x38] sm:$0x1]  ;;  %v56_v7 = vld [vmem:[#allocation2] sm:$0xff]  ;;  %v58_v11 = vld [vmem:[#allocation2 + $0x10] sm:$0xff]  ;;  %vm713_vm6 = vcmask 25600  }
  0x29   :  { %v60_v8 = vld [vmem:[#allocation2 + $0x20] sm:$0x1]  ;;  %v845_v9 = vpack.c.bf16 %v63_v6, %v59_v4  ;;  %v62_v12 = vld [vmem:[#allocation2 + $0x30] sm:$0x1] }
  0x2a   :  { %v842_v10 = vpack.c.bf16 %v60_v8, %v56_v7  ;;  %841 = vmatprep.subr.msk.bf16.mxu0 %vm1005_vm2, %v839_v5  ;;  %v848_v13 = vpack.c.bf16 %v62_v12, %v58_v11  ;;  %v39_v14 = vld [vmem:[#allocation4] sm:$0xff]  ;;  %v40_v15 = vld [vmem:[#allocation4 + $0x10] sm:$0xff] }
  0x2b   :  { %847 = vmatprep.subr.msk.bf16.mxu1 %vm1005_vm2, %v845_v9  ;;  %v41_v16 = vld [vmem:[#allocation4 + $0x20] sm:$0xff]  ;;  %v42_v17 = vld [vmem:[#allocation4 + $0x30] sm:$0xff] }
  0x2c   :  { %844 = vmatpush1.bf16.msk.msra.mxu0 %vm1005_vm2, %v842_v10  ;;  %850 = vmatpush1.bf16.msk.msra.mxu1 %vm1005_vm2, %v848_v13  ;;  %v43_v18 = vld [vmem:[#allocation4 + $0x40] sm:$0xff]  ;;  %v44_v19 = vld [vmem:[#allocation4 + $0x50] sm:$0xff] }
  0x2d   :  { %v45_v20 = vld [vmem:[#allocation4 + $0x60] sm:$0xff]  ;;  %v46_v21 = vld [vmem:[#allocation4 + $0x70] sm:$0xff] }
  0x2e   :  { %v47_v22 = vld [vmem:[#allocation4 + $0x80] sm:$0xff]  ;;  %v48_v23 = vld [vmem:[#allocation4 + $0x90] sm:$0xff] }
  0x2f   :  { %801 = vmatmul.mubr.msk.f32.vlgmr.msra.gmra.mrb[0].mxu0 %vm64_vm3, %v39_v14  ;;  %816 = vmatmul.mubr.msk.f32.vlgmr.msra.gmra.mrb[0].mxu1 %vm64_vm3, %v39_v14  ;;  %v49_v24 = vld [vmem:[#allocation4 + $0xa0] sm:$0xff]  ;;  %v50_v25 = vld [vmem:[#allocation4 + $0xb0] sm:$0xff] }
  0x30   :  { %187 = vmatprep.mubr.f32.mxu0 %v961_v0  ;;  %330 = vmatprep.mubr.f32.mxu1 %v961_v0  ;;  %v51_v26 = vld [vmem:[#allocation4 + $0xc0] sm:$0x1] }
  0x33   :  { %802 = vmatmul.mubr.msk.f32.gmra.mrb[2].mxu0 %vm64_vm3, %v40_v15  ;;  %817 = vmatmul.mubr.msk.f32.gmra.mrb[2].mxu1 %vm64_vm3, %v40_v15 }
  0x34   :  { %193 = vmatprep.mubr.f32.mxu0 %v961_v0  ;;  %336 = vmatprep.mubr.f32.mxu1 %v961_v0 }
  0x37   :  { %803 = vmatmul.mubr.msk.f32.gmra.mrb[4].mxu0 %vm64_vm3, %v41_v16  ;;  %818 = vmatmul.mubr.msk.f32.gmra.mrb[4].mxu1 %vm64_vm3, %v41_v16 }
  0x38   :  { %199 = vmatprep.mubr.f32.mxu0 %v961_v0  ;;  %342 = vmatprep.mubr.f32.mxu1 %v961_v0 }
  0x3b   :  { %804 = vmatmul.mubr.msk.f32.gmra.mrb[6].mxu0 %vm64_vm3, %v42_v17  ;;  %819 = vmatmul.mubr.msk.f32.gmra.mrb[6].mxu1 %vm64_vm3, %v42_v17 }
  0x3c   :  { %205 = vmatprep.mubr.f32.mxu0 %v961_v0  ;;  %348 = vmatprep.mubr.f32.mxu1 %v961_v0 }
  0x3f   :  { %805 = vmatmul.mubr.msk.f32.gmra.mrb[8].mxu0 %vm64_vm3, %v43_v18  ;;  %820 = vmatmul.mubr.msk.f32.gmra.mrb[8].mxu1 %vm64_vm3, %v43_v18 }
  0x40   :  { %211 = vmatprep.mubr.f32.mxu0 %v961_v0  ;;  %354 = vmatprep.mubr.f32.mxu1 %v961_v0 }
  0x43   :  { %806 = vmatmul.mubr.msk.f32.gmra.mrb[10].mxu0 %vm64_vm3, %v44_v19  ;;  %821 = vmatmul.mubr.msk.f32.gmra.mrb[10].mxu1 %vm64_vm3, %v44_v19 }
  0x44   :  { %217 = vmatprep.mubr.f32.mxu0 %v961_v0  ;;  %360 = vmatprep.mubr.f32.mxu1 %v961_v0 }
  0x47   :  { %807 = vmatmul.mubr.msk.f32.gmra.mrb[12].mxu0 %vm64_vm3, %v45_v20  ;;  %822 = vmatmul.mubr.msk.f32.gmra.mrb[12].mxu1 %vm64_vm3, %v45_v20 }
  0x48   :  { %223 = vmatprep.mubr.f32.mxu0 %v961_v0  ;;  %366 = vmatprep.mubr.f32.mxu1 %v961_v0 }
  0x4b   :  { %808 = vmatmul.mubr.msk.f32.gmra.mrb[14].mxu0 %vm64_vm3, %v46_v21  ;;  %823 = vmatmul.mubr.msk.f32.gmra.mrb[14].mxu1 %vm64_vm3, %v46_v21 }
  0x4c   :  { %229 = vmatprep.mubr.f32.mxu0 %v961_v0  ;;  %372 = vmatprep.mubr.f32.mxu1 %v961_v0 }
  0x4f   :  { %809 = vmatmul.mubr.msk.f32.gmra.mrb[16].mxu0 %vm64_vm3, %v47_v22  ;;  %824 = vmatmul.mubr.msk.f32.gmra.mrb[16].mxu1 %vm64_vm3, %v47_v22 }
  0x50   :  { %235 = vmatprep.mubr.f32.mxu0 %v961_v0  ;;  %378 = vmatprep.mubr.f32.mxu1 %v961_v0 }
  0x53   :  { %810 = vmatmul.mubr.msk.f32.gmra.mrb[18].mxu0 %vm64_vm3, %v48_v23  ;;  %825 = vmatmul.mubr.msk.f32.gmra.mrb[18].mxu1 %vm64_vm3, %v48_v23 }
  0x54   :  { %241 = vmatprep.mubr.f32.mxu0 %v961_v0  ;;  %384 = vmatprep.mubr.f32.mxu1 %v961_v0 }
  0x57   :  { %811 = vmatmul.mubr.msk.f32.gmra.mrb[20].mxu0 %vm64_vm3, %v49_v24  ;;  %826 = vmatmul.mubr.msk.f32.gmra.mrb[20].mxu1 %vm64_vm3, %v49_v24 }
  0x58   :  { %247 = vmatprep.mubr.f32.mxu0 %v961_v0  ;;  %390 = vmatprep.mubr.f32.mxu1 %v961_v0 }
  0x5b   :  { %812 = vmatmul.mubr.msk.f32.gmra.mrb[22].mxu0 %vm64_vm3, %v50_v25  ;;  %827 = vmatmul.mubr.msk.f32.gmra.mrb[22].mxu1 %vm64_vm3, %v50_v25 }
  0x5c   :  { %253 = vmatprep.mubr.f32.mxu0 %v961_v0  ;;  %396 = vmatprep.mubr.f32.mxu1 %v961_v0 }
  0x5f   :  { %813 = vmatmul.mubr.msk.f32.gmra.mrb[24].mxu0 %vm64_vm3, %v51_v26  ;;  %828 = vmatmul.mubr.msk.f32.gmra.mrb[24].mxu1 %vm64_vm3, %v51_v26 }
  0x60   :  { %538 = vmatprep.mubr.f32.mxu0 %v961_v0  ;;  %615 = vmatprep.mubr.f32.mxu1 %v961_v0 }
 0x102   :  { %v183_v27 = vpop.f32.mrb[0].mxu0  ;;  %v326_v28 = vpop.f32.mrb[0].mxu1 }
 0x103   :  { %v185_v29 = vpop.f32.mrb[1].mxu0  ;;  %v328_v30 = vpop.f32.mrb[1].mxu1  ;;  %v403_v32 = vmax.f32 %v183_v27, 0.0  ;;  %v405_v36 = vmax.f32 %v326_v28, 0.0 }
 0x104   :  { %v404_v37 = vmax.f32 %v185_v29, 0.0  ;;  %v406_v41 = vmax.f32 %v328_v30, 0.0 }
 0x106   :  { %v189_v31 = vpop.f32.mrb[2].mxu0  ;;  %v332_v34 = vpop.f32.mrb[2].mxu1 }
 0x107   :  { %v407_v33 = vmax.f32 %v189_v31, 0.0  ;;  %v191_v35 = vpop.f32.mrb[3].mxu0  ;;  %v409_v38 = vmax.f32 %v332_v34, 0.0  ;;  %v334_v40 = vpop.f32.mrb[3].mxu1 }
 0x108   :  { %v408_v39 = vmax.f32 %v191_v35, 0.0  ;;  %v410_v43 = vmax.f32 %v334_v40, 0.0 }
 0x109   :  { %v853_v42 = vpack.c.bf16 %v407_v33, %v403_v32  ;;  %v877_v44 = vpack.c.bf16 %v409_v38, %v405_v36 }
 0x10a   :  { %v851_v45 = vpack.c.bf16 %v408_v39, %v404_v37  ;;  %v195_v46 = vpop.f32.mrb[4].mxu0  ;;  %v875_v47 = vpack.c.bf16 %v410_v43, %v406_v41  ;;  %v338_v48 = vpop.f32.mrb[4].mxu1 }
 0x10b   :  { %v197_v49 = vpop.f32.mrb[5].mxu0  ;;  %v340_v50 = vpop.f32.mrb[5].mxu1  ;;  %v411_v52 = vmax.f32 %v195_v46, 0.0  ;;  %v413_v56 = vmax.f32 %v338_v48, 0.0 }
 0x10c   :  { %852 = vmatprep.subr.bf16.mxu0 %v851_v45  ;;  %876 = vmatprep.subr.bf16.mxu1 %v875_v47  ;;  %v412_v57 = vmax.f32 %v197_v49, 0.0  ;;  %v414_v61 = vmax.f32 %v340_v50, 0.0 }
 0x10d   :  { %854 = vmatpush1.bf16.msra.mxu0 %v853_v42  ;;  %878 = vmatpush1.bf16.msra.mxu1 %v877_v44 }
 0x10e   :  { %v201_v51 = vpop.f32.mrb[6].mxu0  ;;  %v344_v54 = vpop.f32.mrb[6].mxu1 }
 0x10f   :  { %v415_v53 = vmax.f32 %v201_v51, 0.0  ;;  %v203_v55 = vpop.f32.mrb[7].mxu0  ;;  %v417_v58 = vmax.f32 %v344_v54, 0.0  ;;  %v346_v60 = vpop.f32.mrb[7].mxu1 }
 0x110   :  { %v416_v59 = vmax.f32 %v203_v55, 0.0  ;;  %v418_v63 = vmax.f32 %v346_v60, 0.0 }
 0x111   :  { %v857_v62 = vpack.c.bf16 %v415_v53, %v411_v52  ;;  %v881_v1 = vpack.c.bf16 %v417_v58, %v413_v56 }
 0x112   :  { %v855_v2 = vpack.c.bf16 %v416_v59, %v412_v57  ;;  %v207_v3 = vpop.f32.mrb[8].mxu0  ;;  %v879_v4 = vpack.c.bf16 %v418_v63, %v414_v61  ;;  %v350_v5 = vpop.f32.mrb[8].mxu1 }
 0x113   :  { %v209_v6 = vpop.f32.mrb[9].mxu0  ;;  %v352_v7 = vpop.f32.mrb[9].mxu1  ;;  %v419_v9 = vmax.f32 %v207_v3, 0.0  ;;  %v421_v13 = vmax.f32 %v350_v5, 0.0 }
 0x114   :  { %856 = vmatprep.subr.bf16.mxu0 %v855_v2  ;;  %880 = vmatprep.subr.bf16.mxu1 %v879_v4  ;;  %v420_v14 = vmax.f32 %v209_v6, 0.0  ;;  %v422_v18 = vmax.f32 %v352_v7, 0.0 }
 0x115   :  { %858 = vmatpush1.bf16.msra.mxu0 %v857_v62  ;;  %882 = vmatpush1.bf16.msra.mxu1 %v881_v1 }
 0x116   :  { %v213_v8 = vpop.f32.mrb[10].mxu0  ;;  %v356_v11 = vpop.f32.mrb[10].mxu1 }
 0x117   :  { %v423_v10 = vmax.f32 %v213_v8, 0.0  ;;  %v215_v12 = vpop.f32.mrb[11].mxu0  ;;  %v425_v15 = vmax.f32 %v356_v11, 0.0  ;;  %v358_v17 = vpop.f32.mrb[11].mxu1 }
 0x118   :  { %v424_v16 = vmax.f32 %v215_v12, 0.0  ;;  %v426_v20 = vmax.f32 %v358_v17, 0.0 }
 0x119   :  { %v861_v19 = vpack.c.bf16 %v423_v10, %v419_v9  ;;  %v885_v21 = vpack.c.bf16 %v425_v15, %v421_v13 }
 0x11a   :  { %v859_v22 = vpack.c.bf16 %v424_v16, %v420_v14  ;;  %v219_v23 = vpop.f32.mrb[12].mxu0  ;;  %v883_v24 = vpack.c.bf16 %v426_v20, %v422_v18  ;;  %v362_v25 = vpop.f32.mrb[12].mxu1 }
 0x11b   :  { %v221_v26 = vpop.f32.mrb[13].mxu0  ;;  %v364_v27 = vpop.f32.mrb[13].mxu1  ;;  %v427_v29 = vmax.f32 %v219_v23, 0.0  ;;  %v429_v33 = vmax.f32 %v362_v25, 0.0 }
 0x11c   :  { %860 = vmatprep.subr.bf16.mxu0 %v859_v22  ;;  %884 = vmatprep.subr.bf16.mxu1 %v883_v24  ;;  %v428_v34 = vmax.f32 %v221_v26, 0.0  ;;  %v430_v38 = vmax.f32 %v364_v27, 0.0 }
 0x11d   :  { %862 = vmatpush1.bf16.msra.mxu0 %v861_v19  ;;  %886 = vmatpush1.bf16.msra.mxu1 %v885_v21 }
 0x11e   :  { %v225_v28 = vpop.f32.mrb[14].mxu0  ;;  %v368_v31 = vpop.f32.mrb[14].mxu1 }
 0x11f   :  { %v431_v30 = vmax.f32 %v225_v28, 0.0  ;;  %v227_v32 = vpop.f32.mrb[15].mxu0  ;;  %v433_v35 = vmax.f32 %v368_v31, 0.0  ;;  %v370_v37 = vpop.f32.mrb[15].mxu1  ;;  %v52_v28 = vld [vmem:[#allocation4 + $0xd0] sm:$0xff] }
 0x120   :  { %v432_v36 = vmax.f32 %v227_v32, 0.0  ;;  %v434_v40 = vmax.f32 %v370_v37, 0.0  ;;  %v53_v31 = vld [vmem:[#allocation4 + $0xe0] sm:$0x3]  ;;  %v54_v32 = vld [vmem:[#allocation4 + $0xf0] sm:$0xf] }
 0x121   :  { %v865_v39 = vpack.c.bf16 %v431_v30, %v427_v29  ;;  %v889_v41 = vpack.c.bf16 %v433_v35, %v429_v33  ;;  %v55_v30 = vld [vmem:[#allocation4 + $0xf8] sm:$0xf] }
 0x122   :  { %v863_v42 = vpack.c.bf16 %v432_v36, %v428_v34  ;;  %v231_v43 = vpop.f32.mrb[16].mxu0  ;;  %v887_v44 = vpack.c.bf16 %v434_v40, %v430_v38  ;;  %v374_v45 = vpop.f32.mrb[16].mxu1 }
 0x123   :  { %v233_v46 = vpop.f32.mrb[17].mxu0  ;;  %v376_v47 = vpop.f32.mrb[17].mxu1  ;;  %v435_v49 = vmax.f32 %v231_v43, 0.0  ;;  %v437_v53 = vmax.f32 %v374_v45, 0.0 }
 0x124   :  { %864 = vmatprep.subr.bf16.mxu0 %v863_v42  ;;  %888 = vmatprep.subr.bf16.mxu1 %v887_v44  ;;  %v436_v54 = vmax.f32 %v233_v46, 0.0  ;;  %v438_v58 = vmax.f32 %v376_v47, 0.0 }
 0x125   :  { %866 = vmatpush1.bf16.msra.mxu0 %v865_v39  ;;  %890 = vmatpush1.bf16.msra.mxu1 %v889_v41 }
 0x126   :  { %v237_v48 = vpop.f32.mrb[18].mxu0  ;;  %v380_v51 = vpop.f32.mrb[18].mxu1 }
 0x127   :  { %v439_v50 = vmax.f32 %v237_v48, 0.0  ;;  %v239_v52 = vpop.f32.mrb[19].mxu0  ;;  %v441_v55 = vmax.f32 %v380_v51, 0.0  ;;  %v382_v57 = vpop.f32.mrb[19].mxu1 }
 0x128   :  { %v440_v56 = vmax.f32 %v239_v52, 0.0  ;;  %v442_v60 = vmax.f32 %v382_v57, 0.0 }
 0x129   :  { %v869_v59 = vpack.c.bf16 %v439_v50, %v435_v49  ;;  %v893_v61 = vpack.c.bf16 %v441_v55, %v437_v53 }
 0x12a   :  { %v867_v62 = vpack.c.bf16 %v440_v56, %v436_v54  ;;  %v243_v63 = vpop.f32.mrb[20].mxu0  ;;  %v891_v1 = vpack.c.bf16 %v442_v60, %v438_v58  ;;  %v386_v2 = vpop.f32.mrb[20].mxu1 }
 0x12b   :  { %v245_v3 = vpop.f32.mrb[21].mxu0  ;;  %v388_v4 = vpop.f32.mrb[21].mxu1  ;;  %v443_v6 = vmax.f32 %v243_v63, 0.0  ;;  %v445_v10 = vmax.f32 %v386_v2, 0.0 }
 0x12c   :  { %868 = vmatprep.subr.bf16.mxu0 %v867_v62  ;;  %892 = vmatprep.subr.bf16.mxu1 %v891_v1  ;;  %v444_v11 = vmax.f32 %v245_v3, 0.0  ;;  %v446_v15 = vmax.f32 %v388_v4, 0.0 }
 0x12d   :  { %870 = vmatpush1.bf16.msra.mxu0 %v869_v59  ;;  %894 = vmatpush1.bf16.msra.mxu1 %v893_v61 }
 0x12e   :  { %v249_v5 = vpop.f32.mrb[22].mxu0  ;;  %v392_v8 = vpop.f32.mrb[22].mxu1 }
 0x12f   :  { %v447_v7 = vmax.f32 %v249_v5, 0.0  ;;  %v251_v9 = vpop.f32.mrb[23].mxu0  ;;  %v449_v12 = vmax.f32 %v392_v8, 0.0  ;;  %v394_v14 = vpop.f32.mrb[23].mxu1 }
 0x130   :  { %v448_v13 = vmax.f32 %v251_v9, 0.0  ;;  %v450_v17 = vmax.f32 %v394_v14, 0.0 }
 0x131   :  { %v873_v16 = vpack.c.bf16 %v447_v7, %v443_v6  ;;  %v897_v18 = vpack.c.bf16 %v449_v12, %v445_v10 }
 0x132   :  { %v871_v19 = vpack.c.bf16 %v448_v13, %v444_v11  ;;  %v255_v20 = vpop.f32.mrb[24].mxu0  ;;  %v895_v21 = vpack.c.bf16 %v450_v17, %v446_v15  ;;  %v398_v22 = vpop.f32.mrb[24].mxu1 }
 0x133   :  { %v257_v23 = vpop.f32.mrb[25].mxu0  ;;  %v400_v25 = vpop.f32.mrb[25].mxu1  ;;  %v451_v27 = vmax.f32 %v255_v20, 0.0  ;;  %v453_v29 = vmax.f32 %v398_v22, 0.0 }
 0x134   :  { %872 = vmatprep.subr.bf16.mxu0 %v871_v19  ;;  %v452_v24 = vmax.f32 %v257_v23, 0.0  ;;  %896 = vmatprep.subr.bf16.mxu1 %v895_v21  ;;  %v454_v26 = vmax.f32 %v400_v25, 0.0 }
 0x135   :  { %874 = vmatpush1.bf16.msra.mxu0 %v873_v16  ;;  %898 = vmatpush1.bf16.msra.mxu1 %v897_v18 }
 0x136   :  { %829 = vmatprep.subr.msk.mxu0 %vm104_vm0, %v452_v24  ;;  %833 = vmatprep.subr.msk.mxu1 %vm104_vm0, %v454_v26 }
 0x139   :  { %830 = vmatpush1.msk.msra.mxu0 %vm104_vm0, %v451_v27  ;;  %834 = vmatpush1.msk.msra.mxu1 %vm104_vm0, %v453_v29 }
 0x13a   :  { %831 = vmatmul.mubr.msk.f32.vlgmr.msra.gmra.mrb[26].mxu0 %vm455_vm4, %v52_v28  ;;  %835 = vmatmul.mubr.msk.f32.vlgmr.msra.gmra.mrb[26].mxu1 %vm455_vm4, %v52_v28 }
 0x13b   :  { %544 = vmatprep.mubr.f32.mxu0 %v961_v0  ;;  %621 = vmatprep.mubr.f32.mxu1 %v961_v0 }
 0x13c   :  { %636 = vmatprep.subr.mxu0 %v55_v30  ;;  %715 = vmatprep.subr.mxu1 %v55_v30 }
 0x13e   :  { %832 = vmatmul.mubr.msk.f32.gmra.mrb[28].mxu0 %vm455_vm4, %v53_v31  ;;  %836 = vmatmul.mubr.msk.f32.gmra.mrb[28].mxu1 %vm455_vm4, %v53_v31 }
 0x140   :  { %637 = vmatpush1.xpose.msra.mxu0 %v54_v32  ;;  %716 = vmatpush1.xpose.msra.mxu1 %v54_v32 }
 0x20d   :  { %v540_v33 = vpop.f32.mrb[26].mxu0  ;;  %v617_v34 = vpop.f32.mrb[26].mxu1 }
 0x20e   :  { %v542_v35 = vpop.f32.mrb[27].mxu0  ;;  %v619_v37 = vpop.f32.mrb[27].mxu1  ;;  %v628_v38 = vmax.f32 %v540_v33, 0.0  ;;  %v630_v40 = vmax.f32 %v617_v34, 0.0 }
 0x20f   :  { %v629_v36 = vmax.f32 %v542_v35, 0.0  ;;  %v631_v39 = vmax.f32 %v619_v37, 0.0 }
 0x211   :  { %v546_v41 = vpop.f32.mrb[28].mxu0  ;;  %700 = vmatprep.mubr.f32.mxu0 %v629_v36  ;;  %v623_v42 = vpop.f32.mrb[28].mxu1  ;;  %779 = vmatprep.mubr.f32.mxu1 %v631_v39 }
 0x212   :  { %v548_v0 = vpop.f32.mrb[29].mxu0  ;;  %701 = vmatmul.mubr.f32.vlgmr.msra.gmra.mrb[30].mxu0 %v628_v38  ;;  %v625_v44 = vpop.f32.mrb[29].mxu1  ;;  %780 = vmatmul.mubr.f32.vlgmr.msra.gmra.mrb[30].mxu1 %v630_v40  ;;  %v632_v45 = vmax.f32 %v546_v41, 0.0  ;;  %v634_v47 = vmax.f32 %v623_v42, 0.0 }
 0x213   :  { %v633_v43 = vmax.f32 %v548_v0, 0.0  ;;  %v635_v46 = vmax.f32 %v625_v44, 0.0 }
 0x215   :  { %705 = vmatprep.mubr.f32.mxu0 %v633_v43  ;;  %784 = vmatprep.mubr.f32.mxu1 %v635_v46 }
 0x216   :  { %706 = vmatmul.mubr.f32.gmra.mrb[32].mxu0 %v632_v45  ;;  %785 = vmatmul.mubr.f32.gmra.mrb[32].mxu1 %v634_v47 }
 0x2e5   :  { %v702_v48 = vpop.f32.mrb[30].mxu0  ;;  %v781_v49 = vpop.f32.mrb[30].mxu1 }
 0x2e6   :  { %712 = vst.msk [vmem:[%s1089_s2] sm:$0xff] %vm711_vm5, %v702_v48  ;;  %v704_v50 = vpop.f32.mrb[31].mxu0  ;;  %837 = vst.msk [vmem:[%s1089_s2 + $0x10] sm:$0xff] %vm711_vm5, %v781_v49  ;;  %v783_v51 = vpop.f32.mrb[31].mxu1 }
 0x2e9   :  { %v707_v52 = vpop.f32.mrb[32].mxu0  ;;  %v786_v53 = vpop.f32.mrb[32].mxu1 }
 0x2ea   :  { %714 = vst.msk [vmem:[%s1089_s2 + $0x8] sm:$0x3] %vm713_vm6, %v707_v52  ;;  %v709_v54 = vpop.f32.mrb[33].mxu0  ;;  %838 = vst.msk [vmem:[%s1089_s2 + $0x18] sm:$0x3] %vm713_vm6, %v786_v53  ;;  %v788_v55 = vpop.f32.mrb[33].mxu1 }
 0x2eb   :  { %797 = vsyncpa [#allocation3], 1 }
 0x2ec   :  { %798 = vsyncpa [#allocation5], 1 }

</bundles_post_ra>
